<compile_context>
chip_gen: v6e
topology: v6e:2x2x1
jax: 0.10.0
libtpu: 0.0.40
codegen_flags: <defaults>
</compile_context>

<pallas_src>
import functools

import jax
import jax.numpy as jnp
from jax.experimental import pallas as pl
from jax.experimental.pallas import tpu as pltpu


def _round_up(x, m):
    return (x + m - 1) // m * m


def _choose_tiles(c_pad, d, itemsize):
    """Pick (bm, bn) for the padded problem size."""
    # Column block: lane-dense multiple of 128; 256 when it divides c_pad
    # (keeps the f32 sim tile / spill pressure modest on v5e as well).
    bn = 256 if c_pad % 256 == 0 else 128
    # Row block: multiple of 8, at least 2 row blocks so the "parallel" axis
    # actually shards across both TensorCores on v7x, within a conservative
    # VMEM budget (double-buffered anchor + diag-positive + positive column
    # tile + f32 sim temporaries).
    vmem_budget = 24 * 1024 * 1024
    bm = 64
    for cand in (512, 256, 128, 64):
        if c_pad % cand or c_pad // cand < 2:
            continue
        est = 2 * (2 * cand + bn) * d * itemsize + 4 * cand * bn * 4
        if est <= vmem_budget:
            bm = cand
            break
    return bm, bn


def _tcn_loss_kernel(a_ref, pcol_ref, pdiag_ref, out_ref, m_sc, l_sc,
                     *, inv_t2, mxu_dtype, c_valid, bn, mask_cols):
    # a_ref:     (bm, D) anchor rows          (resident across the column loop)
    # pcol_ref:  (bn, D) positive column tile (streamed over the column loop)
    # pdiag_ref: (bm, D) positive rows matching the anchor rows (resident)
    # out_ref:   (bm, 1) per-row loss; m_sc / l_sc: (bm, 1) f32 accumulators.
    j = pl.program_id(1)

    @pl.when(j == 0)
    def _():
        m_sc[...] = jnp.full_like(m_sc, -jnp.inf)
        l_sc[...] = jnp.zeros_like(l_sc)

    # Fold the 1/temperature**2 scale into the (bm, D) anchor tile (bm*D VPU
    # ops per step instead of bm*bn on the sim tile), then feed the MXU in
    # mxu_dtype (bf16 when enabled) with f32 accumulation.
    a_s = (a_ref[...].astype(jnp.float32) * inv_t2).astype(mxu_dtype)
    p_c = pcol_ref[...].astype(mxu_dtype)

    # Similarity tile == a @ p.T: contract the last dims of both operands, no
    # transpose materialized.
    sim = jax.lax.dot_general(
        a_s, p_c,
        dimension_numbers=(((1,), (1,)), ((), ())),
        preferred_element_type=jnp.float32,
    )

    if mask_cols:
        # Padded columns (global col index >= C) must not contribute to the
        # logsumexp.  Padding is < 128 <= bn, so every tile keeps at least one
        # valid column and m stays finite.
        col_ids = j * bn + jax.lax.broadcasted_iota(jnp.int32, sim.shape, 1)
        sim = jnp.where(col_ids < c_valid, sim, -jnp.inf)

    # Online (streaming) logsumexp over the column axis.
    m_prev = m_sc[...]
    m_new = jnp.maximum(m_prev, jnp.max(sim, axis=-1, keepdims=True))
    l_sc[...] = l_sc[...] * jnp.exp(m_prev - m_new) + jnp.sum(
        jnp.exp(sim - m_new), axis=-1, keepdims=True)
    m_sc[...] = m_new

    # Finalize this row block once the column reduction is complete.
    @pl.when(j == pl.num_programs(1) - 1)
    def _():
        # Diagonal entries (labels == arange(C)) as a row-wise dot against the
        # row-matched positive tile, using the same (possibly bf16-rounded)
        # operands as the matmul path for numerical consistency.
        p_d = pdiag_ref[...].astype(mxu_dtype).astype(jnp.float32)
        diag = jnp.sum(a_s.astype(jnp.float32) * p_d, axis=-1, keepdims=True)
        # TODO(synk): low priority - emit the per-row losses lane-dense
        # (1, bm) instead of (bm, 1) to avoid a 1-lane masked store here.
        out_ref[...] = m_sc[...] + jnp.log(l_sc[...]) - diag


def tcn_loss_pallas(anchor, positive, temperature, use_bf16_mxu=None):
    C, D = anchor.shape
    c_pad = _round_up(C, 128)
    if c_pad != C:
        pad = ((0, c_pad - C), (0, 0))
        anchor = jnp.pad(anchor, pad)
        positive = jnp.pad(positive, pad)
    bm, bn = _choose_tiles(c_pad, D, anchor.dtype.itemsize)

    if use_bf16_mxu is None:
        # The MXU is bf16-native on v5e/v6e/v7x.  For small D the kernel is
        # EUP/VPU-bound (C^2 exps), so keep f32 operands there; switch to bf16
        # once the contraction is large enough for MXU width / DMA bytes to
        # matter, or when the inputs are already bf16.
        use_bf16_mxu = (anchor.dtype == jnp.bfloat16) or D >= 128
    mxu_dtype = jnp.bfloat16 if use_bf16_mxu else jnp.float32

    inv_t2 = 1.0 / (float(temperature) ** 2)
    kernel = functools.partial(
        _tcn_loss_kernel, inv_t2=inv_t2, mxu_dtype=mxu_dtype,
        c_valid=C, bn=bn, mask_cols=(c_pad != C))

    per_row = pl.pallas_call(
        kernel,
        out_shape=jax.ShapeDtypeStruct((c_pad, 1), jnp.float32),
        grid_spec=pltpu.PrefetchScalarGridSpec(
            num_scalar_prefetch=0,
            grid=(c_pad // bm, c_pad // bn),        # reduction (col) axis last
            in_specs=[
                pl.BlockSpec((bm, D), lambda i, j: (i, 0)),   # anchor rows
                pl.BlockSpec((bn, D), lambda i, j: (j, 0)),   # positive cols
                pl.BlockSpec((bm, D), lambda i, j: (i, 0)),   # positive diag rows
            ],
            out_specs=pl.BlockSpec((bm, 1), lambda i, j: (i, 0)),
            scratch_shapes=[
                pltpu.VMEM((bm, 1), jnp.float32),   # running max  m
                pltpu.VMEM((bm, 1), jnp.float32),   # running sum  l
            ],
        ),
        compiler_params=pltpu.CompilerParams(
            dimension_semantics=("parallel", "arbitrary"),
            vmem_limit_bytes=32 * 1024 * 1024,
        ),
    )(anchor, positive, positive)

    # Padded rows excluded; mean over the C real per-row losses.
    return jnp.mean(per_row[:C])


class TCNPallas:
    """JAX/Pallas port of the PyTorch TCN module (no learnable parameters)."""

    def __init__(self, num_positives, temperature=0.1):
        # NOTE: mirrors PyTorch bug-for-bug -- randint(0, num_positives - 1)
        # is invalid for num_positives == 1 and never samples the last
        # positive slot as the anchor.
        self.num_positives = num_positives
        self.temperature = temperature

    def forward(self, embs, key):
        N, _ = embs.shape
        C = N // self.num_positives

        # Glue: random anchor jitter (mirrors torch.randint(0, num_positives - 1)).
        offsets = jax.random.randint(
            key, shape=(C,), minval=0, maxval=self.num_positives - 1,
            dtype=jnp.int32)
        indices = jnp.arange(0, N, self.num_positives, dtype=jnp.int32) + offsets
        indices_positive = indices + 1

        # TODO(synk): fuse this jittered row gather into the kernel
        # (scalar-prefetch the indices, DMA the contiguous superset block and
        # select rows in-kernel) to skip one HBM round trip of the gathered
        # (C, D) arrays when this op is launched per-step in a training loop.
        anchor = embs[indices]             # (C, D)
        positive = embs[indices_positive]  # (C, D)

        return tcn_loss_pallas(anchor, positive, self.temperature)

    __call__ = forward


def _reference_loss(embs, indices, temperature):
    """Pure-JAX reference for a correctness sanity check."""
    embs = embs.astype(jnp.float32) / temperature
    anchor = embs[indices]
    positive = embs[indices + 1]
    sim = anchor @ positive.T
    labels = jnp.arange(sim.shape[0])
    logp = jax.nn.log_softmax(sim, axis=-1)
    return -jnp.mean(logp[jnp.arange(sim.shape[0]), labels])


if __name__ == "__main__":
    num_positives = 4
    temperature = 0.1
    num_classes = 8
    N = num_classes * num_positives   # sequence length
    D = 32                            # embedding dim

    key = jax.random.PRNGKey(0)
    k_embs, k_idx = jax.random.split(key)
    embs = jax.random.normal(k_embs, (N, D), dtype=jnp.float32)

    model = TCNPallas(num_positives=num_positives, temperature=temperature)
    loss = jax.block_until_ready(model(embs, k_idx))

    # Sanity check against a pure-JAX reference using the same random indices.
    offsets = jax.random.randint(
        k_idx, shape=(num_classes,), minval=0, maxval=num_positives - 1,
        dtype=jnp.int32)
    indices = jnp.arange(0, N, num_positives, dtype=jnp.int32) + offsets
    ref = _reference_loss(embs, indices, temperature)

    assert jnp.isfinite(loss), "loss is not finite"
    assert jnp.allclose(loss, ref, rtol=1e-4, atol=1e-4), (loss, ref)

    print("KERNEL_OK")
</pallas_src>

<mosaic_0001>
module attributes {stable_mosaic.version = 11 : i64} {
  func.func @_tcn_loss_kernel(%arg0: i32, %arg1: i32, %arg2: memref<64x32xf32, #tpu.memory_space<vmem>>, %arg3: memref<128x32xf32, #tpu.memory_space<vmem>>, %arg4: memref<64x32xf32, #tpu.memory_space<vmem>>, %arg5: memref<64x1xf32, #tpu.memory_space<vmem>>, %arg6: memref<64x1xf32, #tpu.memory_space<vmem>>, %arg7: memref<64x1xf32, #tpu.memory_space<vmem>>) attributes {dimension_semantics = [#tpu.dimension_semantics<parallel>, #tpu.dimension_semantics<arbitrary>], iteration_bounds = array<i64: 2, 1>, scalar_prefetch = 0 : i64, scratch_operands = 2 : i64, tpu.core_type = #tpu.core_type<tc>, window_params = [{transform_indices = @transform_0, window_bounds = array<i64: 64, 32>}, {transform_indices = @transform_1, window_bounds = array<i64: 128, 32>}, {transform_indices = @transform_2, window_bounds = array<i64: 64, 32>}, {transform_indices = @transform_3, window_bounds = array<i64: 64, 1>}]} {
    %c0_i32 = arith.constant 0 : i32
    %0 = arith.cmpi eq, %arg1, %c0_i32 : i32
    %1 = arith.extui %0 : i1 to i32
    %c0_i32_0 = arith.constant 0 : i32
    %2 = arith.cmpi ne, %1, %c0_i32_0 : i32
    scf.if %2 {
      %cst_18 = arith.constant 0xFF800000 : f32
      %35 = vector.broadcast %cst_18 : f32 to vector<64x1xf32>
      %c0_19 = arith.constant 0 : index
      %c0_20 = arith.constant 0 : index
      %36 = vector.load %arg6[%c0_19, %c0_20] : memref<64x1xf32, #tpu.memory_space<vmem>>, vector<64x1xf32>
      tpu.vector_store %arg6[%c0_19, %c0_20], %35 {strides = array<i32>} : memref<64x1xf32, #tpu.memory_space<vmem>>, vector<64x1xf32>,
      %cst_21 = arith.constant 0.000000e+00 : f32
      %37 = vector.broadcast %cst_21 : f32 to vector<64x1xf32>
      %c0_22 = arith.constant 0 : index
      %c0_23 = arith.constant 0 : index
      %38 = vector.load %arg7[%c0_22, %c0_23] : memref<64x1xf32, #tpu.memory_space<vmem>>, vector<64x1xf32>
      tpu.vector_store %arg7[%c0_22, %c0_23], %37 {strides = array<i32>} : memref<64x1xf32, #tpu.memory_space<vmem>>, vector<64x1xf32>,
    } else {
    }
    %c0 = arith.constant 0 : index
    %c0_1 = arith.constant 0 : index
    %3 = vector.load %arg2[%c0, %c0_1] : memref<64x32xf32, #tpu.memory_space<vmem>>, vector<64x32xf32>
    %cst = arith.constant 1.000000e+02 : f32
    %4 = vector.broadcast %cst : f32 to vector<64x32xf32>
    %5 = arith.mulf %3, %4 : vector<64x32xf32>
    %c0_2 = arith.constant 0 : index
    %c0_3 = arith.constant 0 : index
    %6 = vector.load %arg3[%c0_2, %c0_3] : memref<128x32xf32, #tpu.memory_space<vmem>>, vector<128x32xf32>
    %cst_4 = arith.constant dense<0.000000e+00> : vector<64x128xf32>
    %7 = tpu.matmul %5, %6, %cst_4 {dimension_numbers = #tpu.dot_dimension_numbers<[1], [1], [0], [0], [0, 0, 1, 0], [], []>} : vector<64x32xf32>, vector<128x32xf32>, vector<64x128xf32> -> vector<64x128xf32>
    %c128_i32 = arith.constant 128 : i32
    %8 = arith.muli %arg1, %c128_i32 : i32
    %9 = tpu.iota {dimensions = array<i32: 1>} : vector<64x128xi32>
    %10 = vector.broadcast %8 : i32 to vector<64x128xi32>
    %11 = arith.addi %10, %9 : vector<64x128xi32>
    %c8_i32 = arith.constant 8 : i32
    %12 = vector.broadcast %c8_i32 : i32 to vector<64x128xi32>
    %13 = arith.cmpi slt, %11, %12 : vector<64x128xi32>
    %cst_5 = arith.constant 0xFF800000 : f32
    %14 = vector.broadcast %cst_5 : f32 to vector<64x128xf32>
    %15 = arith.select %13, %7, %14 : vector<64x128xi1>, vector<64x128xf32>
    %c0_6 = arith.constant 0 : index
    %c0_7 = arith.constant 0 : index
    %16 = vector.load %arg6[%c0_6, %c0_7] : memref<64x1xf32, #tpu.memory_space<vmem>>, vector<64x1xf32>
    %cst_8 = arith.constant dense<0xFF800000> : vector<64xf32>
    %17 = vector.multi_reduction <maximumf>, %15, %cst_8 [1] : vector<64x128xf32> to vector<64xf32>
    %18 = vector.shape_cast %17 : vector<64xf32> to vector<64x1xf32>
    %19 = arith.maximumf %16, %18 : vector<64x1xf32>
    %c0_9 = arith.constant 0 : index
    %c0_10 = arith.constant 0 : index
    %20 = vector.load %arg7[%c0_9, %c0_10] : memref<64x1xf32, #tpu.memory_space<vmem>>, vector<64x1xf32>
    %21 = arith.subf %16, %19 : vector<64x1xf32>
    %22 = math.exp %21 : vector<64x1xf32>
    %23 = arith.mulf %20, %22 : vector<64x1xf32>
    %24 = vector.broadcast %19 : vector<64x1xf32> to vector<64x128xf32>
    %25 = arith.subf %15, %24 : vector<64x128xf32>
    %26 = math.exp %25 : vector<64x128xf32>
    %cst_11 = arith.constant dense<0.000000e+00> : vector<64xf32>
    %27 = vector.multi_reduction <add>, %26, %cst_11 [1] : vector<64x128xf32> to vector<64xf32>
    %28 = vector.shape_cast %27 : vector<64xf32> to vector<64x1xf32>
    %29 = arith.addf %23, %28 : vector<64x1xf32>
    %c0_12 = arith.constant 0 : index
    %c0_13 = arith.constant 0 : index
    %30 = vector.load %arg7[%c0_12, %c0_13] : memref<64x1xf32, #tpu.memory_space<vmem>>, vector<64x1xf32>
    tpu.vector_store %arg7[%c0_12, %c0_13], %29 {strides = array<i32>} : memref<64x1xf32, #tpu.memory_space<vmem>>, vector<64x1xf32>,
    %c0_14 = arith.constant 0 : index
    %c0_15 = arith.constant 0 : index
    %31 = vector.load %arg6[%c0_14, %c0_15] : memref<64x1xf32, #tpu.memory_space<vmem>>, vector<64x1xf32>
    tpu.vector_store %arg6[%c0_14, %c0_15], %19 {strides = array<i32>} : memref<64x1xf32, #tpu.memory_space<vmem>>, vector<64x1xf32>,
    %c0_i32_16 = arith.constant 0 : i32
    %32 = arith.cmpi eq, %arg1, %c0_i32_16 : i32
    %33 = arith.extui %32 : i1 to i32
    %c0_i32_17 = arith.constant 0 : i32
    %34 = arith.cmpi ne, %33, %c0_i32_17 : i32
    scf.if %34 {
      %c0_18 = arith.constant 0 : index
      %c0_19 = arith.constant 0 : index
      %35 = vector.load %arg4[%c0_18, %c0_19] : memref<64x32xf32, #tpu.memory_space<vmem>>, vector<64x32xf32>
      %36 = arith.mulf %5, %35 : vector<64x32xf32>
      %cst_20 = arith.constant dense<0.000000e+00> : vector<64xf32>
      %37 = vector.multi_reduction <add>, %36, %cst_20 [1] : vector<64x32xf32> to vector<64xf32>
      %38 = vector.shape_cast %37 : vector<64xf32> to vector<64x1xf32>
      %c0_21 = arith.constant 0 : index
      %c0_22 = arith.constant 0 : index
      %39 = vector.load %arg6[%c0_21, %c0_22] : memref<64x1xf32, #tpu.memory_space<vmem>>, vector<64x1xf32>
      %c0_23 = arith.constant 0 : index
      %c0_24 = arith.constant 0 : index
      %40 = vector.load %arg7[%c0_23, %c0_24] : memref<64x1xf32, #tpu.memory_space<vmem>>, vector<64x1xf32>
      %41 = math.log %40 : vector<64x1xf32>
      %42 = arith.addf %39, %41 : vector<64x1xf32>
      %43 = arith.subf %42, %38 : vector<64x1xf32>
      %c0_25 = arith.constant 0 : index
      %c0_26 = arith.constant 0 : index
      %44 = vector.load %arg5[%c0_25, %c0_26] : memref<64x1xf32, #tpu.memory_space<vmem>>, vector<64x1xf32>
      tpu.vector_store %arg5[%c0_25, %c0_26], %43 {strides = array<i32>} : memref<64x1xf32, #tpu.memory_space<vmem>>, vector<64x1xf32>,
    } else {
    }
    return
  }
  func.func @transform_0(%arg0: i32, %arg1: i32) -> (i32, i32) {
    %c0_i32 = arith.constant 0 : i32
    %c0_i32_0 = arith.constant 0 : i32
    return %arg0, %c0_i32 : i32, i32
  }
  func.func @transform_1(%arg0: i32, %arg1: i32) -> (i32, i32) {
    %c0_i32 = arith.constant 0 : i32
    %c0_i32_0 = arith.constant 0 : i32
    return %arg1, %c0_i32 : i32, i32
  }
  func.func @transform_2(%arg0: i32, %arg1: i32) -> (i32, i32) {
    %c0_i32 = arith.constant 0 : i32
    %c0_i32_0 = arith.constant 0 : i32
    return %arg0, %c0_i32 : i32, i32
  }
  func.func @transform_3(%arg0: i32, %arg1: i32) -> (i32, i32) {
    %c0_i32 = arith.constant 0 : i32
    %c0_i32_0 = arith.constant 0 : i32
    return %arg0, %c0_i32 : i32, i32
  }
}

</mosaic_0001>

<bundles_post_ra>
// kernel: tpu_custom_call.1
= control target key start
LH: loop header
LB: loop body
LE: loop exit
PB: predicated region body
PF: predicated region fallthrough
CT: control target
= control target key end

     0   :  { %s1105_s12 = smov 0   ;;  %s1107_s13 = smov 0   ;;  %s1502_s0 = inlined_call_operand.vmem [shape: f32[128,32], index: 0, kind: input, shape index: {}]   ;;  %s1503_s1 = inlined_call_operand.vmem [shape: f32[128,32], index: 1, kind: input, shape index: {}]   ;;  %s1504_s2 = inlined_call_operand.vmem [shape: f32[128,32], index: 2, kind: input, shape index: {}]   ;;  %s1505_s3 = inlined_call_operand.vmem [shape: f32[128,1], index: 3, kind: output, shape index: {}]  }
   0x1   :  { %s1109_s14 = smov 0  }
   0x2 LB: > { %s25_s15 = sadd.s32 1, %s1076_s13  ;;  %p848_p0 = scmp.ge.s32.totalorder %s1080_s14, 1  ;;  %s1080_s14 = sphi %s1109_s14, %s13_s14   ;;  %s1076_s13 = sphi %s1107_s13, %s1507_s13   ;;  %s1072_s12 = sphi %s1105_s12, %s1506_s12  }
   0x3   : > { %p27_p1 = scmp.ge.s32.totalorder %s25_s15, 2  ;;  %p172_p2 = scmp.lt.s32.totalorder %s1080_s14, 3 }
   0x5   : > { %s1509_s15 = smov (%p27_p1, %s25_s15), 0  ;;  %p173_p3 = pnand %p848_p0, %p172_p2 }
   0x6   : > { %s849_s20 = sshll.u32 (!%p173_p3), %s1072_s12, 3 }
   0x7   : > { %176 = sbr.rel (%p173_p3) target bundleno = 746 (0x2ea), region = 32  ;;  %p207_p4 = scmp.lt.s32.totalorder (!%p173_p3), %s849_s20, 15 }
   0xc   : > { %v282_v0 = vld [vmem:[%s1503_s1 + $0x78] sm:$0xff]  ;;  %vm283_vm0 = vcmask 261120   ;;  %v281_v1 = vld [vmem:[%s1503_s1 + $0x70] sm:$0xff]  ;;  %s1511_s20 = smov (!%p207_p4, %s849_s20), 15  ;;  %v280_v2 = vld [vmem:[%s1503_s1 + $0x68] sm:$0xff]  ;;  %vm234_vm1 = vcmask 7168   ;;  %v462_v33 = vlaneseq }
   0xd   : > { %905 = vmatprep.subr.msk.mxu0 %vm283_vm0, %v282_v0  ;;  %949 = vmatprep.subr.msk.mxu1 %vm283_vm0, %v282_v0  ;;  %s1138_s23 = sshll.u32 %s1511_s20, 3  ;;  %v279_v5 = vld [vmem:[%s1503_s1 + $0x60] sm:$0xff]  ;;  %v278_v8 = vld [vmem:[%s1503_s1 + $0x58] sm:$0xff]  ;;  %v277_v9 = vld [vmem:[%s1503_s1 + $0x50] sm:$0xff]  ;;  %v1082_v32 = vmov -inf   ;;  %v1083_v51 = vmov 0  }
   0xe   : > { %906 = vmatpush3.xpose.msk.msra.mxu0 %vm283_vm0, %v282_v0  ;;  %965 = vmatpush3.xpose.msk.msra.mxu1 %vm283_vm0, %v282_v0  ;;  %s1146_s26 = scalar_lea.vmem %s1502_s0, %s1138_s23  ;;  %v276_v10 = vld [vmem:[%s1503_s1 + $0x48] sm:$0xff]  ;;  %v275_v11 = vld [vmem:[%s1503_s1 + $0x40] sm:$0xff]  ;;  %v274_v12 = vld [vmem:[%s1503_s1 + $0x38] sm:$0xff]  ;;  %236 = vst.msk [vmem:[#allocation2 + $0x8] sm:$0xff] %vm234_vm1, %v1082_v32  ;;  %v463_v34 = vand.u32 127, %v462_v33  ;;  %v1084_v52 = vmov 0.0   ;;  %s222_s5 = scalar_lea.vmem %s1504_s2, %s1138_s23 }
   0xf   : > { %907 = vmatprep.subr.msk.mxu0 %vm283_vm0, %v281_v1  ;;  %950 = vmatprep.subr.msk.mxu1 %vm283_vm0, %v281_v1  ;;  %v251_v3 = vld [vmem:[%s1146_s26] sm:$0xff]  ;;  %v273_v13 = vld [vmem:[%s1503_s1 + $0x30] sm:$0xff]  ;;  %v272_v14 = vld [vmem:[%s1503_s1 + $0x28] sm:$0xff]  ;;  %235 = vst.msk [vmem:[#allocation2] sm:$0xff] %vm234_vm1, %v1082_v32  ;;  %s1475_s8 = scalar_lea.vmem %s1505_s3, %s1138_s23 }
  0x10   : > { %v255_v4 = vld [vmem:[%s1146_s26 + $0x20] sm:$0xff]  ;;  %v1155_v6 = vmul.f32 100.0, %v251_v3  ;;  %v270_v16 = vld [vmem:[%s1503_s1 + $0x18] sm:$0xff]  ;;  %v269_v17 = vld [vmem:[%s1503_s1 + $0x10] sm:$0xff]  ;;  %237 = vst.msk [vmem:[#allocation2 + $0x10] sm:$0xff] %vm234_vm1, %v1082_v32  ;;  %vm466_vm2 = vcmp.lt.s32.totalorder %v463_v34, 8  ;;  %1009 = vset.pattern.permute.xlu1 %v1083_v51  ;;  %1008 = vset.pattern.permute.xlu0 %v1083_v51 }
  0x11   : > { %v1157_v7 = vmul.f32 100.0, %v255_v4  ;;  %v271_v15 = vld [vmem:[%s1503_s1 + $0x20] sm:$0xff]  ;;  %v268_v18 = vld [vmem:[%s1503_s1 + $0x8] sm:$0xff]  ;;  %v253_v22 = vld [vmem:[%s1146_s26 + $0x10] sm:$0xff]  ;;  %238 = vst.msk [vmem:[#allocation2 + $0x18] sm:$0xff] %vm234_vm1, %v1082_v32 }
  0x12   : > { %908 = vmatpush3.xpose.msk.msra.mxu0 %vm283_vm0, %v281_v1  ;;  %966 = vmatpush3.xpose.msk.msra.mxu1 %vm283_vm0, %v281_v1  ;;  %v267_v19 = vld [vmem:[%s1503_s1] sm:$0xff]  ;;  %v252_v20 = vld [vmem:[%s1146_s26 + $0x8] sm:$0xff]  ;;  %v257_v23 = vld [vmem:[%s1146_s26 + $0x30] sm:$0xff]  ;;  %v1261_v26 = vmul.f32 100.0, %v253_v22  ;;  %239 = vst.msk [vmem:[#allocation2 + $0x20] sm:$0xff] %vm234_vm1, %v1082_v32 }
  0x13   : > { %909 = vmatprep.subr.msk.mxu0 %vm283_vm0, %v280_v2  ;;  %951 = vmatprep.subr.msk.mxu1 %vm283_vm0, %v280_v2  ;;  %v256_v21 = vld [vmem:[%s1146_s26 + $0x28] sm:$0xff]  ;;  %v1255_v24 = vmul.f32 100.0, %v252_v20  ;;  %v254_v27 = vld [vmem:[%s1146_s26 + $0x18] sm:$0xff]  ;;  %v1264_v28 = vmul.f32 100.0, %v257_v23  ;;  %240 = vst.msk [vmem:[#allocation2 + $0x28] sm:$0xff] %vm234_vm1, %v1082_v32  ;;  %241 = vst.msk [vmem:[#allocation2 + $0x30] sm:$0xff] %vm234_vm1, %v1082_v32 }
  0x14   : > { %937 = vmatprep.mubr.msk.f32.mxu0 %vm283_vm0, %v1155_v6  ;;  %943 = vmatprep.mubr.msk.f32.mxu1 %vm283_vm0, %v1157_v7  ;;  %v1257_v25 = vmul.f32 100.0, %v256_v21  ;;  %v258_v29 = vld [vmem:[%s1146_s26 + $0x38] sm:$0xff]  ;;  %v1271_v30 = vmul.f32 100.0, %v254_v27  ;;  %242 = vst.msk [vmem:[#allocation2 + $0x38] sm:$0xff] %vm234_vm1, %v1082_v32  ;;  %244 = vst.msk [vmem:[#allocation3 + $0x8] sm:$0xff] %vm234_vm1, %v1084_v52 }
  0x15   : > { %v1273_v31 = vmul.f32 100.0, %v258_v29  ;;  %243 = vst.msk [vmem:[#allocation3] sm:$0xff] %vm234_vm1, %v1084_v52  ;;  %245 = vst.msk [vmem:[#allocation3 + $0x10] sm:$0xff] %vm234_vm1, %v1084_v52  ;;  %v1331_v53 = vld [vmem:[#allocation2 + $0x8] sm:$0xff] }
  0x16   : > { %910 = vmatpush3.xpose.msk.msra.mxu0 %vm283_vm0, %v280_v2  ;;  %967 = vmatpush3.xpose.msk.msra.mxu1 %vm283_vm0, %v280_v2  ;;  %246 = vst.msk [vmem:[#allocation3 + $0x18] sm:$0xff] %vm234_vm1, %v1084_v52  ;;  %247 = vst.msk [vmem:[#allocation3 + $0x20] sm:$0xff] %vm234_vm1, %v1084_v52  ;;  %v1341_v59 = vld [vmem:[#allocation2] sm:$0xff] }
  0x17   : > { %911 = vmatprep.subr.msk.mxu0 %vm283_vm0, %v279_v5  ;;  %952 = vmatprep.subr.msk.mxu1 %vm283_vm0, %v279_v5  ;;  %248 = vst.msk [vmem:[#allocation3 + $0x28] sm:$0xff] %vm234_vm1, %v1084_v52  ;;  %249 = vst.msk [vmem:[#allocation3 + $0x30] sm:$0xff] %vm234_vm1, %v1084_v52  ;;  %v1362_v4 = vld [vmem:[#allocation2 + $0x10] sm:$0xff] }
  0x18   : > { %250 = vst.msk [vmem:[#allocation3 + $0x38] sm:$0xff] %vm234_vm1, %v1084_v52  ;;  %v1343_v60 = vld [vmem:[#allocation2 + $0x18] sm:$0xff] }
  0x19   : > { %v1360_v3 = vld [vmem:[#allocation2 + $0x20] sm:$0xff] }
  0x1a   : > { %912 = vmatpush3.xpose.msk.msra.mxu0 %vm283_vm0, %v279_v5  ;;  %968 = vmatpush3.xpose.msk.msra.mxu1 %vm283_vm0, %v279_v5  ;;  %v1333_v54 = vld [vmem:[#allocation2 + $0x28] sm:$0xff] }
  0x1b   : > { %913 = vmatprep.subr.msk.mxu0 %vm283_vm0, %v278_v8  ;;  %953 = vmatprep.subr.msk.mxu1 %vm283_vm0, %v278_v8 }
  0x1e   : > { %914 = vmatpush3.xpose.msk.msra.mxu0 %vm283_vm0, %v278_v8  ;;  %969 = vmatpush3.xpose.msk.msra.mxu1 %vm283_vm0, %v278_v8 }
  0x1f   : > { %915 = vmatprep.subr.msk.mxu0 %vm283_vm0, %v277_v9  ;;  %954 = vmatprep.subr.msk.mxu1 %vm283_vm0, %v277_v9 }
  0x22   : > { %916 = vmatpush3.xpose.msk.msra.mxu0 %vm283_vm0, %v277_v9  ;;  %970 = vmatpush3.xpose.msk.msra.mxu1 %vm283_vm0, %v277_v9 }
  0x23   : > { %917 = vmatprep.subr.msk.mxu0 %vm283_vm0, %v276_v10  ;;  %955 = vmatprep.subr.msk.mxu1 %vm283_vm0, %v276_v10 }
  0x26   : > { %918 = vmatpush3.xpose.msk.msra.mxu0 %vm283_vm0, %v276_v10  ;;  %971 = vmatpush3.xpose.msk.msra.mxu1 %vm283_vm0, %v276_v10 }
  0x27   : > { %919 = vmatprep.subr.msk.mxu0 %vm283_vm0, %v275_v11  ;;  %956 = vmatprep.subr.msk.mxu1 %vm283_vm0, %v275_v11 }
  0x2a   : > { %920 = vmatpush3.xpose.msk.msra.mxu0 %vm283_vm0, %v275_v11  ;;  %972 = vmatpush3.xpose.msk.msra.mxu1 %vm283_vm0, %v275_v11 }
  0x2b   : > { %921 = vmatprep.subr.msk.mxu0 %vm283_vm0, %v274_v12  ;;  %957 = vmatprep.subr.msk.mxu1 %vm283_vm0, %v274_v12 }
  0x2e   : > { %922 = vmatpush3.xpose.msk.msra.mxu0 %vm283_vm0, %v274_v12  ;;  %973 = vmatpush3.xpose.msk.msra.mxu1 %vm283_vm0, %v274_v12 }
  0x2f   : > { %923 = vmatprep.subr.msk.mxu0 %vm283_vm0, %v273_v13  ;;  %958 = vmatprep.subr.msk.mxu1 %vm283_vm0, %v273_v13 }
  0x32   : > { %924 = vmatpush3.xpose.msk.msra.mxu0 %vm283_vm0, %v273_v13  ;;  %974 = vmatpush3.xpose.msk.msra.mxu1 %vm283_vm0, %v273_v13  ;;  %v1380_v13 = vld [vmem:[#allocation2 + $0x30] sm:$0xff] }
  0x33   : > { %925 = vmatprep.subr.msk.mxu0 %vm283_vm0, %v272_v14  ;;  %959 = vmatprep.subr.msk.mxu1 %vm283_vm0, %v272_v14 }
  0x36   : > { %926 = vmatpush3.xpose.msk.msra.mxu0 %vm283_vm0, %v272_v14  ;;  %975 = vmatpush3.xpose.msk.msra.mxu1 %vm283_vm0, %v272_v14  ;;  %v1382_v14 = vld [vmem:[#allocation2 + $0x38] sm:$0xff] }
  0x37   : > { %927 = vmatprep.subr.msk.mxu0 %vm283_vm0, %v271_v15  ;;  %960 = vmatprep.subr.msk.mxu1 %vm283_vm0, %v271_v15 }
  0x3a   : > { %928 = vmatpush3.xpose.msk.msra.mxu0 %vm283_vm0, %v271_v15  ;;  %976 = vmatpush3.xpose.msk.msra.mxu1 %vm283_vm0, %v271_v15 }
  0x3b   : > { %929 = vmatprep.subr.msk.mxu0 %vm283_vm0, %v270_v16  ;;  %961 = vmatprep.subr.msk.mxu1 %vm283_vm0, %v270_v16 }
  0x3e   : > { %930 = vmatpush3.xpose.msk.msra.mxu0 %vm283_vm0, %v270_v16  ;;  %977 = vmatpush3.xpose.msk.msra.mxu1 %vm283_vm0, %v270_v16 }
  0x3f   : > { %931 = vmatprep.subr.msk.mxu0 %vm283_vm0, %v269_v17  ;;  %962 = vmatprep.subr.msk.mxu1 %vm283_vm0, %v269_v17 }
  0x42   : > { %932 = vmatpush3.xpose.msk.msra.mxu0 %vm283_vm0, %v269_v17  ;;  %978 = vmatpush3.xpose.msk.msra.mxu1 %vm283_vm0, %v269_v17 }
  0x43   : > { %933 = vmatprep.subr.msk.mxu0 %vm283_vm0, %v268_v18  ;;  %963 = vmatprep.subr.msk.mxu1 %vm283_vm0, %v268_v18 }
  0x46   : > { %934 = vmatpush3.xpose.msk.msra.mxu0 %vm283_vm0, %v268_v18  ;;  %979 = vmatpush3.xpose.msk.msra.mxu1 %vm283_vm0, %v268_v18 }
  0x47   : > { %935 = vmatprep.subr.msk.mxu0 %vm283_vm0, %v267_v19  ;;  %964 = vmatprep.subr.msk.mxu1 %vm283_vm0, %v267_v19 }
  0x4a   : > { %936 = vmatpush3.xpose.msk.msra.mxu0 %vm283_vm0, %v267_v19  ;;  %980 = vmatpush3.xpose.msk.msra.mxu1 %vm283_vm0, %v267_v19 }
  0x4d   : > { %938 = vmatmul.mubr.msk.f32.vlgmr.msra.gmra.mxu0 %vm283_vm0, %v1255_v24  ;;  %944 = vmatmul.mubr.msk.f32.vlgmr.msra.gmra.mxu1 %vm283_vm0, %v1257_v25 }
  0x4e   : > { %940 = vmatprep.mubr.msk.f32.mxu0 %vm283_vm0, %v1261_v26  ;;  %946 = vmatprep.mubr.msk.f32.mxu1 %vm283_vm0, %v1264_v28 }
  0x51   : > { %941 = vmatmul.mubr.msk.f32.gmra.mxu0 %vm283_vm0, %v1271_v30  ;;  %947 = vmatmul.mubr.msk.f32.gmra.mxu1 %vm283_vm0, %v1273_v31 }
 0x10d   : > { %v939_v35 = vpop.f32.mrf.mxu0  ;;  %v945_v36 = vpop.f32.mrf.mxu1 }
 0x10e   : > { %v1292_v37 = vsel %vm466_vm2, %v939_v35, -inf  ;;  %v1295_v38 = vsel %vm466_vm2, %v945_v36, -inf }
 0x10f   : > { %485 = vmax.xlane.f32.xlu0 %v1292_v37  ;;  %v422_v39 = vpop.f32.mrf.mxu0  ;;  %v442_v40 = vpop.f32.mrf.mxu1  ;;  %493 = vmax.xlane.f32.xlu1 %v1295_v38 }
 0x110   : > { %v1300_v43 = vsel %vm466_vm2, %v422_v39, -inf  ;;  %v1311_v48 = vsel %vm466_vm2, %v442_v40, -inf }
 0x111   : > { %v942_v41 = vpop.f32.mrf.mxu0  ;;  %v948_v42 = vpop.f32.mrf.mxu1 }
 0x112   : > { %v1303_v44 = vsel %vm466_vm2, %v942_v41, -inf  ;;  %v1319_v50 = vsel %vm466_vm2, %v948_v42, -inf }
 0x113   : > { %483 = vmax.xlane.f32.xlu0 %v1300_v43  ;;  %489 = vmax.xlane.f32.xlu1 %v1303_v44  ;;  %v432_v45 = vpop.f32.mrf.mxu0  ;;  %v452_v47 = vpop.f32.mrf.mxu1 }
 0x114   : > { %v1308_v46 = vsel %vm466_vm2, %v432_v45, -inf  ;;  %v1316_v49 = vsel %vm466_vm2, %v452_v47, -inf }
 0x117   : > { %491 = vmax.xlane.f32.xlu0 %v1311_v48  ;;  %487 = vmax.xlane.f32.xlu1 %v1308_v46 }
 0x11b   : > { %495 = vmax.xlane.f32.xlu0 %v1316_v49  ;;  %497 = vmax.xlane.f32.xlu1 %v1319_v50 }
 0x198   : > { %v486_v55 = vpop.xlane.xlu0 %485  ;;  %v494_v56 = vpop.xlane.xlu1 %493 }
 0x199   : > { %v1336_v57 = vmax.f32 %v1331_v53, %v486_v55  ;;  %v1339_v58 = vmax.f32 %v1333_v54, %v494_v56 }
 0x19b   : > { %v516_v61 = vsub.f32 %v1331_v53, %v1336_v57  ;;  %645 = vst.msk [vmem:[#allocation2 + $0x8] sm:$0xff] %vm234_vm1, %v1336_v57  ;;  %554 = vperm.xlu1 %1009, %v1336_v57   ;;  %v520_v62 = vsub.f32 %v1333_v54, %v1339_v58  ;;  %649 = vst.msk [vmem:[#allocation2 + $0x28] sm:$0xff] %vm234_vm1, %v1339_v58 }
 0x19c   : > { %v484_v63 = vpop.xlane.xlu0 %483  ;;  %v490_v0 = vpop.xlane.xlu1 %489 }
 0x19d   : > { %v1355_v1 = vmax.f32 %v1341_v59, %v484_v63  ;;  %v1358_v2 = vmax.f32 %v1343_v60, %v490_v0 }
 0x19f   : > { %v515_v5 = vsub.f32 %v1341_v59, %v1355_v1  ;;  %644 = vst.msk [vmem:[#allocation2] sm:$0xff] %vm234_vm1, %v1355_v1  ;;  %549 = vperm.xlu0 %1008, %v1355_v1   ;;  %574 = vperm.xlu1 %1009, %v1339_v58   ;;  %v518_v8 = vsub.f32 %v1343_v60, %v1358_v2  ;;  %647 = vst.msk [vmem:[#allocation2 + $0x18] sm:$0xff] %vm234_vm1, %v1358_v2  ;;  %v508_v58 = vld [vmem:[#allocation3 + $0x8] sm:$0xff] }
 0x1a0   : > { %v492_v9 = vpop.xlane.xlu0 %491  ;;  %v488_v10 = vpop.xlane.xlu1 %487 }
 0x1a1   : > { %v1375_v11 = vmax.f32 %v1360_v3, %v492_v9  ;;  %v1378_v12 = vmax.f32 %v1362_v4, %v488_v10  ;;  %v529_v53 = vmul.f32 1.442695, %v518_v8  ;;  %v511_v8 = vld [vmem:[#allocation3 + $0x20] sm:$0xff] }
 0x1a3   : > { %v519_v15 = vsub.f32 %v1360_v3, %v1375_v11  ;;  %648 = vst.msk [vmem:[#allocation2 + $0x20] sm:$0xff] %vm234_vm1, %v1375_v11  ;;  %569 = vperm.xlu1 %1009, %v1375_v11   ;;  %v517_v16 = vsub.f32 %v1362_v4, %v1378_v12  ;;  %646 = vst.msk [vmem:[#allocation2 + $0x10] sm:$0xff] %vm234_vm1, %v1378_v12 }
 0x1a4   : > { %v496_v17 = vpop.xlane.xlu0 %495  ;;  %v498_v18 = vpop.xlane.xlu1 %497 }
 0x1a5   : > { %v1394_v19 = vmax.f32 %v1380_v13, %v496_v17  ;;  %v1397_v20 = vmax.f32 %v1382_v14, %v498_v18  ;;  %v527_v54 = vmul.f32 1.442695, %v517_v16 }
 0x1a7   : > { %564 = vperm.xlu1 %1009, %v1358_v2   ;;  %v521_v21 = vsub.f32 %v1380_v13, %v1394_v19  ;;  %650 = vst.msk [vmem:[#allocation2 + $0x30] sm:$0xff] %vm234_vm1, %v1394_v19  ;;  %v522_v22 = vsub.f32 %v1382_v14, %v1397_v20  ;;  %651 = vst.msk [vmem:[#allocation2 + $0x38] sm:$0xff] %vm234_vm1, %v1397_v20  ;;  %v510_v14 = vld [vmem:[#allocation3 + $0x18] sm:$0xff] }
 0x1a9   : > { %v537_v60 = vmul.f32 1.442695, %v522_v22 }
 0x1ab   : > { %559 = vperm.xlu1 %1009, %v1378_v12  }
 0x1af   : > { %579 = vperm.xlu1 %1009, %v1394_v19  }
 0x1b3   : > { %584 = vperm.xlu1 %1009, %v1397_v20  }
 0x216   : > { %v555_v23 = vpop.permute.xlu1 %554 }
 0x217   : > { %v588_v27 = vsub.f32 %v1292_v37, %v555_v23 }
 0x219   : > { %v597_v29 = vmul.f32 1.442695, %v588_v27  ;;  %v656_v27 = vld [vmem:[%s222_s5 + $0x8] sm:$0xff] }
 0x21a   : > { %v550_v32 = vpop.permute.xlu0 %549  ;;  %v575_v33 = vpop.permute.xlu1 %574 }
 0x21b   : > { %1010 = vpow2.f32 %v597_v29  ;;  %v592_v34 = vsub.f32 %v1295_v38, %v575_v33  ;;  %v587_v35 = vsub.f32 %v1300_v43, %v550_v32  ;;  %v657_v29 = vld [vmem:[%s222_s5 + $0x10] sm:$0xff]  ;;  %v664_v33 = vmul.f32 %v656_v27, %v1255_v24 }
 0x21c   : > { %v513_v27 = vld [vmem:[#allocation3 + $0x30] sm:$0xff] }
 0x21d   : > { %v605_v36 = vmul.f32 1.442695, %v592_v34  ;;  %v595_v41 = vmul.f32 1.442695, %v587_v35  ;;  %v665_v34 = vmul.f32 %v657_v29, %v1261_v26  ;;  %v658_v35 = vld [vmem:[%s222_s5 + $0x18] sm:$0xff] }
 0x21e   : > { %v570_v39 = vpop.permute.xlu1 %569 }
 0x21f   : > { %v591_v40 = vsub.f32 %v1311_v48, %v570_v39  ;;  %1012 = vpow2.f32 %v605_v36  ;;  %v659_v36 = vld [vmem:[%s222_s5 + $0x20] sm:$0xff] }
 0x221   : > { %v603_v42 = vmul.f32 1.442695, %v591_v40  ;;  %v674_v40 = vsel %vm283_vm0, %v664_v33, 0.0 }
 0x222   : > { %v565_v45 = vpop.permute.xlu1 %564 }
 0x223   : > { %1014 = vpow2.f32 %v603_v42  ;;  %v590_v47 = vsub.f32 %v1303_v44, %v565_v45  ;;  %v667_v42 = vmul.f32 %v659_v36, %v1157_v7  ;;  %v660_v45 = vld [vmem:[%s222_s5 + $0x28] sm:$0xff]  ;;  %v514_v36 = vld [vmem:[#allocation3 + $0x38] sm:$0xff] }
 0x224   : > { %1016 = vpow2.f32 %v595_v41  ;;  %v677_v41 = vsel %vm283_vm0, %v665_v34, 0.0 }
 0x225   : > { %v601_v37 = vmul.f32 1.442695, %v590_v47  ;;  %v661_v47 = vld [vmem:[%s222_s5 + $0x30] sm:$0xff]  ;;  %v683_v26 = vsel %vm283_vm0, %v667_v42, 0.0 }
 0x226   : > { %v560_v51 = vpop.permute.xlu1 %559 }
 0x227   : > { %1018 = vpow2.f32 %v601_v37  ;;  %v589_v52 = vsub.f32 %v1308_v46, %v560_v51  ;;  %v668_v37 = vmul.f32 %v660_v45, %v1257_v25  ;;  %v669_v51 = vmul.f32 %v661_v47, %v1264_v28 }
 0x228   : > { %v1011_v38 = vpop.eup %1010  ;;  %v525_v25 = vmul.f32 1.442695, %v516_v61  ;;  %v533_v28 = vmul.f32 1.442695, %v520_v62  ;;  %v535_v61 = vmul.f32 1.442695, %v521_v21 }
 0x229   : > { %v599_v55 = vmul.f32 1.442695, %v589_v52  ;;  %613 = vadd.xlane.f32.xlu0 %v1011_v38  ;;  %v662_v52 = vld [vmem:[%s222_s5 + $0x38] sm:$0xff]  ;;  %v686_v38 = vsel %vm283_vm0, %v668_v37, 0.0 }
 0x22a   : > { %v580_v43 = vpop.permute.xlu1 %579  ;;  %v670_v7 = vmul.f32 %v662_v52, %v1273_v31  ;;  %v523_v31 = vmul.f32 1.442695, %v515_v5  ;;  %v512_v5 = vld [vmem:[#allocation3 + $0x28] sm:$0xff] }
 0x22b   : > { %1020 = vpow2.f32 %v599_v55  ;;  %v593_v48 = vsub.f32 %v1316_v49, %v580_v43  ;;  %v655_v49 = vld [vmem:[%s222_s5] sm:$0xff]  ;;  %v531_v43 = vmul.f32 1.442695, %v519_v15 }
 0x22c   : > { %v1013_v56 = vpop.eup %1012  ;;  %v663_v23 = vmul.f32 %v655_v49, %v1155_v6  ;;  %v666_v6 = vmul.f32 %v658_v35, %v1271_v30  ;;  %v689_v30 = vsel %vm283_vm0, %v669_v51, 0.0  ;;  %v692_v55 = vsel %vm283_vm0, %v670_v7, 0.0  ;;  %v507_v15 = vld [vmem:[#allocation3] sm:$0xff] }
 0x22d   : > { %v607_v63 = vmul.f32 1.442695, %v593_v48  ;;  %621 = vadd.xlane.f32.xlu1 %v1013_v56 }
 0x22e   : > { %v585_v0 = vpop.permute.xlu1 %584  ;;  %v671_v32 = vsel %vm283_vm0, %v663_v23, 0.0  ;;  %v680_v24 = vsel %vm283_vm0, %v666_v6, 0.0 }
 0x22f   : > { %1022 = vpow2.f32 %v607_v63  ;;  %v594_v44 = vsub.f32 %v1319_v50, %v585_v0 }
 0x230   : > { %v1015_v9 = vpop.eup %1014 }
 0x231   : > { %v1017_v10 = vpop.eup %1016  ;;  %v609_v17 = vmul.f32 1.442695, %v594_v44  ;;  %619 = vadd.xlane.f32.xlu0 %v1015_v9  ;;  %v509_v9 = vld [vmem:[#allocation3 + $0x10] sm:$0xff] }
 0x232   : > { %611 = vadd.xlane.f32.xlu1 %v1017_v10 }
 0x233   : > { %1024 = vpow2.f32 %v609_v17 }
 0x234   : > { %v1019_v46 = vpop.eup %1018  ;;  %1026 = vpow2.f32 %v525_v25 }
 0x235   : > { %1028 = vpow2.f32 %v533_v28 }
 0x236   : > { %617 = vadd.xlane.f32.xlu1 %v1019_v46  ;;  %1030 = vpow2.f32 %v531_v43 }
 0x237   : > { %1032 = vpow2.f32 %v523_v31 }
 0x238   : > { %v1021_v18 = vpop.eup %1020  ;;  %1034 = vpow2.f32 %v529_v53 }
 0x239   : > { %615 = vadd.xlane.f32.xlu0 %v1021_v18  ;;  %1036 = vpow2.f32 %v527_v54 }
 0x23a   : > { %1038 = vpow2.f32 %v535_v61  ;;  %v700_v61 = vld [vmem:[#allocation2 + $0x28] sm:$0xff] }
 0x23b   : > { %1040 = vpow2.f32 %v537_v60 }
 0x23c   : > { %v1023_v50 = vpop.eup %1022 }
 0x23d   : > { %623 = vadd.xlane.f32.xlu0 %v1023_v50 }
 0x240   : > { %v1025_v39 = vpop.eup %1024 }
 0x241   : > { %625 = vadd.xlane.f32.xlu1 %v1025_v39  ;;  %672 = vadd.xlane.f32.xlu0 %v671_v32  ;;  %v1027_v57 = vpop.eup %1026 }
 0x242   : > { %v540_v59 = vmul.f32 %v1027_v57, %v508_v58  ;;  %v1029_v1 = vpop.eup %1028  ;;  %v699_v57 = vld [vmem:[#allocation2 + $0x20] sm:$0xff] }
 0x243   : > { %v1031_v2 = vpop.eup %1030  ;;  %v544_v4 = vmul.f32 %v1029_v1, %v512_v5 }
 0x244   : > { %v1033_v11 = vpop.eup %1032  ;;  %v543_v16 = vmul.f32 %v1031_v2, %v511_v8 }
 0x245   : > { %675 = vadd.xlane.f32.xlu1 %v674_v40  ;;  %678 = vadd.xlane.f32.xlu0 %v677_v41  ;;  %v539_v21 = vmul.f32 %v1033_v11, %v507_v15  ;;  %v1035_v48 = vpop.eup %1034  ;;  %v698_v15 = vld [vmem:[#allocation2 + $0x18] sm:$0xff] }
 0x246   : > { %v1037_v0 = vpop.eup %1036  ;;  %v542_v44 = vmul.f32 %v1035_v48, %v510_v14 }
 0x247   : > { %v541_v46 = vmul.f32 %v1037_v0, %v509_v9  ;;  %v1039_v18 = vpop.eup %1038 }
 0x248   : > { %v545_v32 = vmul.f32 %v1039_v18, %v513_v27  ;;  %v1041_v34 = vpop.eup %1040 }
 0x249   : > { %681 = vadd.xlane.f32.xlu1 %v680_v24  ;;  %684 = vadd.xlane.f32.xlu0 %v683_v26  ;;  %v546_v40 = vmul.f32 %v1041_v34, %v514_v36  ;;  %v696_v26 = vld [vmem:[#allocation2 + $0x8] sm:$0xff] }
 0x24d   : > { %687 = vadd.xlane.f32.xlu1 %v686_v38  ;;  %690 = vadd.xlane.f32.xlu0 %v689_v30 }
 0x251   : > { %693 = vadd.xlane.f32.xlu1 %v692_v55 }
 0x2b2   : > { %v614_v62 = vpop.xlane.xlu0 %613 }
 0x2b3   : > { %v628_v3 = vadd.f32 %v614_v62, %v540_v59  ;;  %v695_v62 = vld [vmem:[#allocation2] sm:$0xff] }
 0x2b5   : > { %637 = vst.msk [vmem:[#allocation3 + $0x8] sm:$0xff] %vm234_vm1, %v628_v3 }
 0x2b6   : > { %v622_v12 = vpop.xlane.xlu1 %621 }
 0x2b7   : > { %v632_v13 = vadd.f32 %v622_v12, %v544_v4 }
 0x2b9   : > { %641 = vst.msk [vmem:[#allocation3 + $0x28] sm:$0xff] %vm234_vm1, %v632_v13 }
 0x2ba   : > { %v620_v19 = vpop.xlane.xlu0 %619 }
 0x2bb   : > { %v631_v56 = vadd.f32 %v620_v19, %v543_v16  ;;  %v612_v63 = vpop.xlane.xlu1 %611 }
 0x2bc   : > { %v627_v20 = vadd.f32 %v612_v63, %v539_v21  ;;  %v704_v22 = vld [vmem:[#allocation3 + $0x8] sm:$0xff]  ;;  %v697_v21 = vld [vmem:[#allocation2 + $0x10] sm:$0xff] }
 0x2bd   : > { %640 = vst.msk [vmem:[#allocation3 + $0x20] sm:$0xff] %vm234_vm1, %v631_v56  ;;  %1042 = vlog2.f32 %v704_v22  ;;  %v701_v22 = vld [vmem:[#allocation2 + $0x30] sm:$0xff] }
 0x2be   : > { %636 = vst.msk [vmem:[#allocation3] sm:$0xff] %vm234_vm1, %v627_v20 }
 0x2bf   : > { %v618_v10 = vpop.xlane.xlu1 %617 }
 0x2c0   : > { %v630_v17 = vadd.f32 %v618_v10, %v542_v44  ;;  %v708_v49 = vld [vmem:[#allocation3 + $0x28] sm:$0xff] }
 0x2c1   : > { %1044 = vlog2.f32 %v708_v49 }
 0x2c2   : > { %639 = vst.msk [vmem:[#allocation3 + $0x18] sm:$0xff] %vm234_vm1, %v630_v17  ;;  %v616_v23 = vpop.xlane.xlu0 %615 }
 0x2c3   : > { %v629_v29 = vadd.f32 %v616_v23, %v541_v46  ;;  %v702_v46 = vld [vmem:[#allocation2 + $0x38] sm:$0xff] }
 0x2c4   : > { %v707_v50 = vld [vmem:[#allocation3 + $0x20] sm:$0xff] }
 0x2c5   : > { %638 = vst.msk [vmem:[#allocation3 + $0x10] sm:$0xff] %vm234_vm1, %v629_v29  ;;  %v703_v33 = vld [vmem:[#allocation3] sm:$0xff]  ;;  %1046 = vlog2.f32 %v707_v50 }
 0x2c6   : > { %v624_v35 = vpop.xlane.xlu0 %623  ;;  %1048 = vlog2.f32 %v703_v33 }
 0x2c7   : > { %v633_v39 = vadd.f32 %v624_v35, %v545_v32 }
 0x2c9   : > { %642 = vst.msk [vmem:[#allocation3 + $0x30] sm:$0xff] %vm234_vm1, %v633_v39  ;;  %v706_v41 = vld [vmem:[#allocation3 + $0x18] sm:$0xff] }
 0x2ca   : > { %v1043_v6 = vpop.eup %1042  ;;  %v626_v42 = vpop.xlane.xlu1 %625  ;;  %1050 = vlog2.f32 %v706_v41 }
 0x2cb   : > { %v673_v45 = vpop.xlane.xlu0 %672  ;;  %v634_v47 = vadd.f32 %v626_v42, %v546_v40  ;;  %v714_v24 = vmul.f32 0.6931472, %v1043_v6 }
 0x2cc   : > { %v705_v37 = vld [vmem:[#allocation3 + $0x10] sm:$0xff] }
 0x2cd   : > { %643 = vst.msk [vmem:[#allocation3 + $0x38] sm:$0xff] %vm234_vm1, %v634_v47  ;;  %v728_v51 = vadd.f32 %v714_v24, %v696_v26  ;;  %1052 = vlog2.f32 %v705_v37 }
 0x2ce   : > { %v676_v52 = vpop.xlane.xlu1 %675  ;;  %v1045_v30 = vpop.eup %1044 }
 0x2cf   : > { %v679_v38 = vpop.xlane.xlu0 %678  ;;  %v736_v7 = vsub.f32 %v728_v51, %v676_v52  ;;  %v722_v25 = vmul.f32 0.6931472, %v1045_v30 }
 0x2d0   : > { %v709_v55 = vld [vmem:[#allocation3 + $0x30] sm:$0xff] }
 0x2d1   : > { %744 = vst.msk [vmem:[%s1475_s8 + $0x8] sm:$0xff] %vm234_vm1, %v736_v7  ;;  %1054 = vlog2.f32 %v709_v55  ;;  %v732_v3 = vadd.f32 %v722_v25, %v700_v61 }
 0x2d2   : > { %v1047_v28 = vpop.eup %1046  ;;  %v682_v43 = vpop.xlane.xlu1 %681 }
 0x2d3   : > { %v1049_v31 = vpop.eup %1048  ;;  %v720_v53 = vmul.f32 0.6931472, %v1047_v28  ;;  %v685_v58 = vpop.xlane.xlu0 %684 }
 0x2d4   : > { %v712_v54 = vmul.f32 0.6931472, %v1049_v31  ;;  %v710_v59 = vld [vmem:[#allocation3 + $0x38] sm:$0xff] }
 0x2d5   : > { %v731_v1 = vadd.f32 %v720_v53, %v699_v57  ;;  %1056 = vlog2.f32 %v710_v59 }
 0x2d6   : > { %v727_v5 = vadd.f32 %v712_v54, %v695_v62  ;;  %v688_v60 = vpop.xlane.xlu1 %687 }
 0x2d7   : > { %v1051_v2 = vpop.eup %1050  ;;  %v739_v4 = vsub.f32 %v731_v1, %v685_v58  ;;  %v740_v8 = vsub.f32 %v732_v3, %v688_v60  ;;  %v691_v0 = vpop.xlane.xlu0 %690 }
 0x2d8   : > { %v735_v11 = vsub.f32 %v727_v5, %v673_v45  ;;  %v718_v12 = vmul.f32 0.6931472, %v1051_v2 }
 0x2d9   : > { %747 = vst.msk [vmem:[%s1475_s8 + $0x20] sm:$0xff] %vm234_vm1, %v739_v4  ;;  %748 = vst.msk [vmem:[%s1475_s8 + $0x28] sm:$0xff] %vm234_vm1, %v740_v8 }
 0x2da   : > { %v1053_v13 = vpop.eup %1052  ;;  %743 = vst.msk [vmem:[%s1475_s8] sm:$0xff] %vm234_vm1, %v735_v11  ;;  %v730_v16 = vadd.f32 %v718_v12, %v698_v15  ;;  %v694_v49 = vpop.xlane.xlu1 %693 }
 0x2db   : > { %v716_v19 = vmul.f32 0.6931472, %v1053_v13 }
 0x2dc   : > { %v738_v48 = vsub.f32 %v730_v16, %v682_v43 }
 0x2dd   : > { %v729_v56 = vadd.f32 %v716_v19, %v697_v21 }
 0x2de   : > { %v1055_v63 = vpop.eup %1054  ;;  %746 = vst.msk [vmem:[%s1475_s8 + $0x18] sm:$0xff] %vm234_vm1, %v738_v48 }
 0x2df   : > { %v737_v14 = vsub.f32 %v729_v56, %v679_v38  ;;  %v724_v20 = vmul.f32 0.6931472, %v1055_v63 }
 0x2e1   : > { %745 = vst.msk [vmem:[%s1475_s8 + $0x10] sm:$0xff] %vm234_vm1, %v737_v14  ;;  %v733_v44 = vadd.f32 %v724_v20, %v701_v22 }
 0x2e2   : > { %v1057_v9 = vpop.eup %1056 }
 0x2e3   : > { %v741_v10 = vsub.f32 %v733_v44, %v691_v0  ;;  %v726_v17 = vmul.f32 0.6931472, %v1057_v9 }
 0x2e5   : > { %749 = vst.msk [vmem:[%s1475_s8 + $0x30] sm:$0xff] %vm234_vm1, %v741_v10  ;;  %v734_v18 = vadd.f32 %v726_v17, %v702_v46 }
 0x2e7   : > { %v742_v23 = vsub.f32 %v734_v18, %v694_v49 }
 0x2e9   : > { %750 = vst.msk [vmem:[%s1475_s8 + $0x38] sm:$0xff] %vm234_vm1, %v742_v23 }
 0x2ea PF: > { %s13_s14 = sadd.s32 1, %s1080_s14   ;;  %s1506_s12 = smov %s1076_s13 }
 0x2eb   : > { %p10_p5 = scmp.ge.s32.totalorder %s13_s14, 4   ;;  %s1507_s13 = smov %s1509_s15 }
 0x2ed   :  { %12 = sbr.rel (!%p10_p5) target bundleno = 2 (0x2), region = 76 }

</bundles_post_ra>
